<compile_context>
chip_gen: v7x
topology: tpu7x:2x2x1
jax: 0.10.0
libtpu: 0.0.40
codegen_flags: <defaults>
</compile_context>

<pallas_src>
import functools

import jax
import jax.numpy as jnp
from jax import lax
from jax.experimental import pallas as pl
from jax.experimental.pallas import tpu as pltpu

_TWO31 = 1 << 31
# Stateless-hash constants (murmur3 fmix32 finalizer + odd stream constants).
_K_ROW = 0x9E3779B1
_K_T = 0x85EBCA77
_M1 = 0x85EBCA6B
_M2 = 0xC2B2AE35


def _mix32(x):
    """murmur3 fmix32 avalanche on uint32 arrays."""
    x = x ^ (x >> 16)
    x = x * jnp.uint32(_M1)
    x = x ^ (x >> 13)
    x = x * jnp.uint32(_M2)
    x = x ^ (x >> 16)
    return x


def _floordiv_const(x, d):
    """floor(x / d) for non-negative int32 arrays (x < 2**24) and Python int d > 0."""
    if d & (d - 1) == 0:                               # power of two -> shift
        return x >> (d.bit_length() - 1)
    q = (x.astype(jnp.float32) * (1.0 / d)).astype(jnp.int32)   # within +-1
    r = x - q * d
    return q + (r >= d).astype(jnp.int32) - (r < 0).astype(jnp.int32)


def _m3_kernel(seed_ref, *refs, n_mods, seq_len, tb, layouts, bounds, scale,
               m3_sequential):
    """refs = (x_0..x_{n-1}, o_0..o_{n-1}); layouts[m] = ("folded", D, Q) | ("plain", D)."""
    x_refs = refs[:n_mods]
    o_refs = refs[n_mods:]

    blk = pl.program_id(0)
    seed_u = seed_ref[0].astype(jnp.uint32)

    # (TB, 1, 1) row-hash base: one per global sample, shared by every modality.
    row = lax.broadcasted_iota(jnp.int32, (tb, 1, 1), 0)
    base = (blk * tb + row).astype(jnp.uint32) * jnp.uint32(_K_ROW) + seed_u

    def finish(h):
        """uint32 avalanche -> int32 uniform in [0, 2**31)."""
        return (_mix32(h) >> 1).astype(jnp.int32)

    def in_bucket(bits, m):
        """Inverse-CDF categorical bucket test: drop modality m iff bits in [lo, hi)."""
        lo, hi = bounds[m], bounds[m + 1]
        if lo >= hi:                                   # empty bucket (p_mod[m] ~ 0)
            return jnp.zeros(bits.shape, dtype=jnp.bool_)
        terms = []
        if lo > 0:
            terms.append(bits >= jnp.int32(lo))
        if hi < _TWO31:
            terms.append(bits < jnp.int32(hi))
        if not terms:                                  # single-modality degenerate case
            return jnp.ones(bits.shape, dtype=jnp.bool_)
        drop = terms[0]
        for t in terms[1:]:
            drop = jnp.logical_and(drop, t)
        return drop

    # Draws cached per layout key so modalities sharing a feature dim (or the
    # per-sample / per-(sample,timestep) broadcast case) reuse one mix32 pass.
    bits_cache = {}

    def get_bits(m):
        lay = layouts[m]
        if not m3_sequential:
            key = "sample"                              # one draw per sample
        elif lay[0] == "plain":
            key = "plain"                               # one draw per (sample, t)
        else:
            key = ("folded", lay[1])                    # keyed by feature dim D
        if key in bits_cache:
            return bits_cache[key]

        if key == "sample":
            bits = finish(base)                                         # (TB,1,1)
        elif key == "plain":
            t = lax.broadcasted_iota(jnp.int32, (1, seq_len, 1), 1)
            tk = t.astype(jnp.uint32) * jnp.uint32(_K_T)
            bits = finish(base + tk)                                    # (TB,L,1)
        else:
            d, q = lay[1], lay[2]
            # Recover each element's timestep from its flat (q, lane) position;
            # computed at (1, Q, 128) so iota + floordiv cost is independent of TB.
            flat = (lax.broadcasted_iota(jnp.int32, (1, q, 128), 1) * 128
                    + lax.broadcasted_iota(jnp.int32, (1, q, 128), 2))
            tk = _floordiv_const(flat, d).astype(jnp.uint32) * jnp.uint32(_K_T)
            bits = finish(base + tk)                                    # (TB,Q,128)

        bits_cache[key] = bits
        return bits

    for m in range(n_mods):
        x = x_refs[m][...]
        if scale != 1.0:                               # rescaling trick (masking=False)
            x = x * jnp.asarray(scale, x.dtype)
        o_refs[m][...] = jnp.where(in_bucket(get_bits(m), m),
                                   jnp.zeros((), x.dtype), x)


def _choose_tb(batch, bytes_per_sample, budget_bytes=6 * 1024 * 1024):
    """Largest divisor of `batch` whose per-step slab stays under the budget."""
    tb = max(1, min(batch, budget_bytes // max(1, bytes_per_sample)))
    while batch % tb != 0:
        tb -= 1
    return tb


def _masked_forward(seed, mods, *, L, dims, bounds, scale, m3_sequential):
    """Runs the M^3 Pallas kernel (assumes the drop gate fired)."""
    batch = mods[0].shape[0]
    n = len(mods)

    layouts, kern_in = [], []
    for x, d in zip(mods, dims):
        if d % 128 != 0 and (L * d) % 128 == 0 and (L * d) < (1 << 24):
            q = (L * d) // 128
            layouts.append(("folded", d, q))
            kern_in.append(x.reshape(batch, q, 128))   # lane-dense view (free reshape)
        else:
            layouts.append(("plain", d))
            kern_in.append(x)

    bytes_per_sample = sum(L * d * x.dtype.itemsize for x, d in zip(mods, dims))
    # TODO(synk): add a sequence-tile grid axis for very long sequences where a
    # single sample (L * sum(D)) no longer fits the per-step VMEM budget.
    tb = _choose_tb(batch, bytes_per_sample)

    def idx(i, seed_ref):                              # seed_ref: scalar-prefetch operand
        return (i, 0, 0)

    in_specs, out_specs, out_shape = [], [], []
    for x in kern_in:
        spec = pl.BlockSpec((tb,) + tuple(x.shape[1:]), idx)
        in_specs.append(spec)
        out_specs.append(spec)
        out_shape.append(jax.ShapeDtypeStruct(x.shape, x.dtype))

    kernel = functools.partial(
        _m3_kernel, n_mods=n, seq_len=L, tb=tb, layouts=tuple(layouts),
        bounds=tuple(bounds), scale=scale, m3_sequential=m3_sequential)

    outs = pl.pallas_call(
        kernel,
        grid_spec=pltpu.PrefetchScalarGridSpec(
            num_scalar_prefetch=1,
            grid=(batch // tb,),
            in_specs=in_specs,
            out_specs=out_specs),
        out_shape=tuple(out_shape),
        compiler_params=pltpu.CompilerParams(
            dimension_semantics=("parallel",),         # distinct output block per step
            vmem_limit_bytes=48 * 1024 * 1024),
    )(seed, *kern_in)

    return tuple(
        o.reshape(x.shape) if lay[0] == "folded" else o
        for o, x, lay in zip(outs, mods, layouts))


def hard_multimodal_masking(mods, key, *, p=0.5, p_mod=None, masking=True,
                            m3_sequential=True, training=True):
    """JAX/Pallas equivalent of HardMultimodalMasking.forward(*mods)."""
    mods = list(mods)
    n = len(mods)
    B, L = int(mods[0].shape[0]), int(mods[0].shape[1])
    dims = [int(x.shape[2]) for x in mods]

    if p_mod is None:
        p_mod = [1.0 / n] * n
    total = float(sum(p_mod))
    cum, acc = [], 0.0
    for w in p_mod:
        acc += float(w) / total
        cum.append(acc)
    # Integer categorical thresholds in [0, 2**31] (inverse-CDF buckets).
    bounds = [0] + [min(_TWO31, int(round(c * _TWO31))) for c in cum[:-1]] + [_TWO31]

    # Rescaling trick (applied regardless of training, matching the PyTorch code).
    scale = 1.0
    if (not masking) and p > 0:
        scale = 1.0 / (1.0 - p / n)

    def unmasked(ms):
        if scale != 1.0:
            return tuple(x * jnp.asarray(scale, x.dtype) for x in ms)
        return tuple(ms)

    # Eval / p<=0: the kernel can never fire -> skip all kernel HBM traffic.
    if (not training) or p <= 0.0:
        return list(unmasked(tuple(mods)))

    gate_key, seed_key = jax.random.split(key)
    seed = jax.random.randint(seed_key, (1,), 0, jnp.iinfo(jnp.int32).max,
                              dtype=jnp.int32)

    masked = functools.partial(_masked_forward, L=L, dims=tuple(dims),
                               bounds=tuple(bounds), scale=scale,
                               m3_sequential=m3_sequential)

    if p >= 1.0:                                       # gate always fires
        return list(masked(seed, tuple(mods)))

    gate = jax.random.uniform(gate_key) < p            # one draw per forward call
    outs = lax.cond(gate,
                    lambda op: masked(op[0], op[1]),
                    lambda op: unmasked(op[1]),
                    (seed, tuple(mods)))
    return list(outs)


if __name__ == "__main__":
    key = jax.random.PRNGKey(0)
    kx0, kx1, kx2, kcall, kcall2 = jax.random.split(key, 5)

    B, L = 2, 8
    x0 = jax.random.normal(kx0, (B, L, 32), dtype=jnp.float32)
    x1 = jax.random.normal(kx1, (B, L, 16), dtype=jnp.float32)
    x2 = jax.random.normal(kx2, (B, L, 64), dtype=jnp.float32)
    xs = [x0, x1, x2]

    # 1) p=1.0, sequential M^3: the gate always fires -> Pallas kernel path.
    outs = jax.block_until_ready(
        hard_multimodal_masking(xs, kcall, p=1.0, masking=True,
                                m3_sequential=True, training=True))
    zeroed = sum(jnp.all(o == 0.0, axis=-1).astype(jnp.int32) for o in outs)
    assert bool(jnp.all(zeroed == 1)), "exactly one modality masked per (b, t)"
    for x, o in zip(xs, outs):
        keep = ~jnp.all(o == 0.0, axis=-1, keepdims=True)
        assert bool(jnp.all(jnp.where(keep, o == x, True))), "kept entries untouched"

    # 2) p=1.0, non-sequential: exactly one modality fully zeroed per sample.
    outs_ns = jax.block_until_ready(
        hard_multimodal_masking(xs, kcall, p=1.0, masking=True,
                                m3_sequential=False, training=True))
    dropped = jnp.stack([jnp.all(jnp.all(o == 0.0, axis=-1), axis=-1)
                         for o in outs_ns]).astype(jnp.int32)          # (n, B)
    assert bool(jnp.all(jnp.sum(dropped, axis=0) == 1))
    for x, o in zip(xs, outs_ns):
        kept = ~jnp.all(jnp.all(o == 0.0, axis=-1), axis=-1)           # (B,)
        assert bool(jnp.all(jnp.where(kept[:, None, None], o == x, True)))

    # 3) 0 < p < 1: gate short-circuit via lax.cond (kernel skipped if it misses).
    outs2 = jax.block_until_ready(
        hard_multimodal_masking(xs, kcall2, p=0.5, masking=True,
                                m3_sequential=True, training=True))
    for x, o in zip(xs, outs2):
        assert o.shape == x.shape and o.dtype == x.dtype
        assert bool(jnp.all((o == x) | (o == 0.0)))

    # 4) Mixed feature dims: already-lane-dense (128), folded non-pow2 (96),
    #    and plain fallback (24) layouts in one call.
    ky0, ky1, ky2, kcall3 = jax.random.split(kcall2, 4)
    ys = [jax.random.normal(ky0, (B, L, 128), dtype=jnp.float32),
          jax.random.normal(ky1, (B, L, 96), dtype=jnp.float32),
          jax.random.normal(ky2, (B, L, 24), dtype=jnp.float32)]
    outs_mix = jax.block_until_ready(
        hard_multimodal_masking(ys, kcall3, p=1.0, masking=True,
                                m3_sequential=True, training=True))
    zeroed_mix = sum(jnp.all(o == 0.0, axis=-1).astype(jnp.int32) for o in outs_mix)
    assert bool(jnp.all(zeroed_mix == 1))
    for y, o in zip(ys, outs_mix):
        keep = ~jnp.all(o == 0.0, axis=-1, keepdims=True)
        assert bool(jnp.all(jnp.where(keep, o == y, True)))

    # 5) Eval path with the rescaling trick (no kernel, pure JAX).
    outs3 = jax.block_until_ready(
        hard_multimodal_masking(xs, kcall, p=0.5, masking=False,
                                m3_sequential=True, training=False))
    for x, o in zip(xs, outs3):
        assert bool(jnp.allclose(o, x * (1.0 / (1.0 - 0.5 / 3.0))))

    print("KERNEL_OK")
</pallas_src>

<mosaic_0001>
module attributes {stable_mosaic.version = 11 : i64} {
  func.func @_m3_kernel(%arg0: i32, %arg1: memref<1xi32, #tpu.memory_space<smem>>, %arg2: memref<2x2x128xf32, #tpu.memory_space<vmem>>, %arg3: memref<2x1x128xf32, #tpu.memory_space<vmem>>, %arg4: memref<2x4x128xf32, #tpu.memory_space<vmem>>, %arg5: memref<2x2x128xf32, #tpu.memory_space<vmem>>, %arg6: memref<2x1x128xf32, #tpu.memory_space<vmem>>, %arg7: memref<2x4x128xf32, #tpu.memory_space<vmem>>) attributes {dimension_semantics = [#tpu.dimension_semantics<parallel>], iteration_bounds = array<i64: 1>, scalar_prefetch = 1 : i64, scratch_operands = 0 : i64, tpu.core_type = #tpu.core_type<tc>, window_params = [{transform_indices = @transform_0, window_bounds = array<i64: 2, 2, 128>}, {transform_indices = @transform_1, window_bounds = array<i64: 2, 1, 128>}, {transform_indices = @transform_2, window_bounds = array<i64: 2, 4, 128>}, {transform_indices = @transform_3, window_bounds = array<i64: 2, 2, 128>}, {transform_indices = @transform_4, window_bounds = array<i64: 2, 1, 128>}, {transform_indices = @transform_5, window_bounds = array<i64: 2, 4, 128>}]} {
    %c0 = arith.constant 0 : index
    %0 = memref.load %arg1[%c0] : memref<1xi32, #tpu.memory_space<smem>>
    %1 = tpu.iota {dimensions = array<i32: 0>} : vector<2x1x1xi32>
    %c2_i32 = arith.constant 2 : i32
    %2 = arith.muli %arg0, %c2_i32 : i32
    %3 = vector.broadcast %2 : i32 to vector<2x1x1xi32>
    %4 = arith.addi %3, %1 : vector<2x1x1xi32>
    %c-1640531535_i32 = arith.constant -1640531535 : i32
    %5 = vector.broadcast %c-1640531535_i32 : i32 to vector<2x1x1xi32>
    %6 = arith.muli %4, %5 : vector<2x1x1xi32>
    %7 = vector.broadcast %0 : i32 to vector<2x1x1xi32>
    %8 = arith.addi %6, %7 : vector<2x1x1xi32>
    %c0_0 = arith.constant 0 : index
    %c0_1 = arith.constant 0 : index
    %c0_2 = arith.constant 0 : index
    %9 = vector.load %arg2[%c0_0, %c0_1, %c0_2] : memref<2x2x128xf32, #tpu.memory_space<vmem>>, vector<2x2x128xf32>
    %10 = tpu.iota {dimensions = array<i32: 1>} : vector<1x2x128xi32>
    %c128_i32 = arith.constant 128 : i32
    %11 = vector.broadcast %c128_i32 : i32 to vector<1x2x128xi32>
    %12 = arith.muli %10, %11 : vector<1x2x128xi32>
    %13 = tpu.iota {dimensions = array<i32: 2>} : vector<1x2x128xi32>
    %14 = arith.addi %12, %13 : vector<1x2x128xi32>
    %c5_i32 = arith.constant 5 : i32
    %15 = vector.broadcast %c5_i32 : i32 to vector<1x2x128xi32>
    %16 = arith.shrsi %14, %15 : vector<1x2x128xi32>
    %c-2048144777_i32 = arith.constant -2048144777 : i32
    %17 = vector.broadcast %c-2048144777_i32 : i32 to vector<1x2x128xi32>
    %18 = arith.muli %16, %17 : vector<1x2x128xi32>
    %19 = vector.broadcast %8 : vector<2x1x1xi32> to vector<2x2x128xi32>
    %20 = vector.broadcast %18 : vector<1x2x128xi32> to vector<2x2x128xi32>
    %21 = arith.addi %19, %20 : vector<2x2x128xi32>
    %c16_i32 = arith.constant 16 : i32
    %22 = vector.broadcast %c16_i32 : i32 to vector<2x2x128xi32>
    %23 = arith.shrui %21, %22 : vector<2x2x128xi32>
    %24 = arith.xori %21, %23 : vector<2x2x128xi32>
    %c-2048144789_i32 = arith.constant -2048144789 : i32
    %25 = vector.broadcast %c-2048144789_i32 : i32 to vector<2x2x128xi32>
    %26 = arith.muli %24, %25 : vector<2x2x128xi32>
    %c13_i32 = arith.constant 13 : i32
    %27 = vector.broadcast %c13_i32 : i32 to vector<2x2x128xi32>
    %28 = arith.shrui %26, %27 : vector<2x2x128xi32>
    %29 = arith.xori %26, %28 : vector<2x2x128xi32>
    %c-1028477387_i32 = arith.constant -1028477387 : i32
    %30 = vector.broadcast %c-1028477387_i32 : i32 to vector<2x2x128xi32>
    %31 = arith.muli %29, %30 : vector<2x2x128xi32>
    %c16_i32_3 = arith.constant 16 : i32
    %32 = vector.broadcast %c16_i32_3 : i32 to vector<2x2x128xi32>
    %33 = arith.shrui %31, %32 : vector<2x2x128xi32>
    %34 = arith.xori %31, %33 : vector<2x2x128xi32>
    %c1_i32 = arith.constant 1 : i32
    %35 = vector.broadcast %c1_i32 : i32 to vector<2x2x128xi32>
    %36 = arith.shrui %34, %35 : vector<2x2x128xi32>
    %c715827883_i32 = arith.constant 715827883 : i32
    %37 = vector.broadcast %c715827883_i32 : i32 to vector<2x2x128xi32>
    %38 = arith.cmpi slt, %36, %37 : vector<2x2x128xi32>
    %cst = arith.constant 0.000000e+00 : f32
    %39 = vector.broadcast %cst : f32 to vector<2x2x128xf32>
    %40 = arith.select %38, %39, %9 : vector<2x2x128xi1>, vector<2x2x128xf32>
    %c0_4 = arith.constant 0 : index
    %c0_5 = arith.constant 0 : index
    %c0_6 = arith.constant 0 : index
    %41 = vector.load %arg5[%c0_4, %c0_5, %c0_6] : memref<2x2x128xf32, #tpu.memory_space<vmem>>, vector<2x2x128xf32>
    tpu.vector_store %arg5[%c0_4, %c0_5, %c0_6], %40 {strides = array<i32>} : memref<2x2x128xf32, #tpu.memory_space<vmem>>, vector<2x2x128xf32>,
    %c0_7 = arith.constant 0 : index
    %c0_8 = arith.constant 0 : index
    %c0_9 = arith.constant 0 : index
    %42 = vector.load %arg3[%c0_7, %c0_8, %c0_9] : memref<2x1x128xf32, #tpu.memory_space<vmem>>, vector<2x1x128xf32>
    %43 = tpu.iota {dimensions = array<i32: 1>} : vector<1x1x128xi32>
    %c128_i32_10 = arith.constant 128 : i32
    %44 = vector.broadcast %c128_i32_10 : i32 to vector<1x1x128xi32>
    %45 = arith.muli %43, %44 : vector<1x1x128xi32>
    %46 = tpu.iota {dimensions = array<i32: 2>} : vector<1x1x128xi32>
    %47 = arith.addi %45, %46 : vector<1x1x128xi32>
    %c4_i32 = arith.constant 4 : i32
    %48 = vector.broadcast %c4_i32 : i32 to vector<1x1x128xi32>
    %49 = arith.shrsi %47, %48 : vector<1x1x128xi32>
    %c-2048144777_i32_11 = arith.constant -2048144777 : i32
    %50 = vector.broadcast %c-2048144777_i32_11 : i32 to vector<1x1x128xi32>
    %51 = arith.muli %49, %50 : vector<1x1x128xi32>
    %52 = vector.broadcast %8 : vector<2x1x1xi32> to vector<2x1x128xi32>
    %53 = vector.broadcast %51 : vector<1x1x128xi32> to vector<2x1x128xi32>
    %54 = arith.addi %52, %53 : vector<2x1x128xi32>
    %c16_i32_12 = arith.constant 16 : i32
    %55 = vector.broadcast %c16_i32_12 : i32 to vector<2x1x128xi32>
    %56 = arith.shrui %54, %55 : vector<2x1x128xi32>
    %57 = arith.xori %54, %56 : vector<2x1x128xi32>
    %c-2048144789_i32_13 = arith.constant -2048144789 : i32
    %58 = vector.broadcast %c-2048144789_i32_13 : i32 to vector<2x1x128xi32>
    %59 = arith.muli %57, %58 : vector<2x1x128xi32>
    %c13_i32_14 = arith.constant 13 : i32
    %60 = vector.broadcast %c13_i32_14 : i32 to vector<2x1x128xi32>
    %61 = arith.shrui %59, %60 : vector<2x1x128xi32>
    %62 = arith.xori %59, %61 : vector<2x1x128xi32>
    %c-1028477387_i32_15 = arith.constant -1028477387 : i32
    %63 = vector.broadcast %c-1028477387_i32_15 : i32 to vector<2x1x128xi32>
    %64 = arith.muli %62, %63 : vector<2x1x128xi32>
    %c16_i32_16 = arith.constant 16 : i32
    %65 = vector.broadcast %c16_i32_16 : i32 to vector<2x1x128xi32>
    %66 = arith.shrui %64, %65 : vector<2x1x128xi32>
    %67 = arith.xori %64, %66 : vector<2x1x128xi32>
    %c1_i32_17 = arith.constant 1 : i32
    %68 = vector.broadcast %c1_i32_17 : i32 to vector<2x1x128xi32>
    %69 = arith.shrui %67, %68 : vector<2x1x128xi32>
    %c715827883_i32_18 = arith.constant 715827883 : i32
    %70 = vector.broadcast %c715827883_i32_18 : i32 to vector<2x1x128xi32>
    %71 = arith.cmpi sge, %69, %70 : vector<2x1x128xi32>
    %c1431655765_i32 = arith.constant 1431655765 : i32
    %72 = vector.broadcast %c1431655765_i32 : i32 to vector<2x1x128xi32>
    %73 = arith.cmpi slt, %69, %72 : vector<2x1x128xi32>
    %74 = arith.andi %71, %73 : vector<2x1x128xi1>
    %cst_19 = arith.constant 0.000000e+00 : f32
    %75 = vector.broadcast %cst_19 : f32 to vector<2x1x128xf32>
    %76 = arith.select %74, %75, %42 : vector<2x1x128xi1>, vector<2x1x128xf32>
    %c0_20 = arith.constant 0 : index
    %c0_21 = arith.constant 0 : index
    %c0_22 = arith.constant 0 : index
    %77 = vector.load %arg6[%c0_20, %c0_21, %c0_22] : memref<2x1x128xf32, #tpu.memory_space<vmem>>, vector<2x1x128xf32>
    tpu.vector_store %arg6[%c0_20, %c0_21, %c0_22], %76 {strides = array<i32>} : memref<2x1x128xf32, #tpu.memory_space<vmem>>, vector<2x1x128xf32>,
    %c0_23 = arith.constant 0 : index
    %c0_24 = arith.constant 0 : index
    %c0_25 = arith.constant 0 : index
    %78 = vector.load %arg4[%c0_23, %c0_24, %c0_25] : memref<2x4x128xf32, #tpu.memory_space<vmem>>, vector<2x4x128xf32>
    %79 = tpu.iota {dimensions = array<i32: 1>} : vector<1x4x128xi32>
    %c128_i32_26 = arith.constant 128 : i32
    %80 = vector.broadcast %c128_i32_26 : i32 to vector<1x4x128xi32>
    %81 = arith.muli %79, %80 : vector<1x4x128xi32>
    %82 = tpu.iota {dimensions = array<i32: 2>} : vector<1x4x128xi32>
    %83 = arith.addi %81, %82 : vector<1x4x128xi32>
    %c6_i32 = arith.constant 6 : i32
    %84 = vector.broadcast %c6_i32 : i32 to vector<1x4x128xi32>
    %85 = arith.shrsi %83, %84 : vector<1x4x128xi32>
    %c-2048144777_i32_27 = arith.constant -2048144777 : i32
    %86 = vector.broadcast %c-2048144777_i32_27 : i32 to vector<1x4x128xi32>
    %87 = arith.muli %85, %86 : vector<1x4x128xi32>
    %88 = vector.broadcast %8 : vector<2x1x1xi32> to vector<2x4x128xi32>
    %89 = vector.broadcast %87 : vector<1x4x128xi32> to vector<2x4x128xi32>
    %90 = arith.addi %88, %89 : vector<2x4x128xi32>
    %c16_i32_28 = arith.constant 16 : i32
    %91 = vector.broadcast %c16_i32_28 : i32 to vector<2x4x128xi32>
    %92 = arith.shrui %90, %91 : vector<2x4x128xi32>
    %93 = arith.xori %90, %92 : vector<2x4x128xi32>
    %c-2048144789_i32_29 = arith.constant -2048144789 : i32
    %94 = vector.broadcast %c-2048144789_i32_29 : i32 to vector<2x4x128xi32>
    %95 = arith.muli %93, %94 : vector<2x4x128xi32>
    %c13_i32_30 = arith.constant 13 : i32
    %96 = vector.broadcast %c13_i32_30 : i32 to vector<2x4x128xi32>
    %97 = arith.shrui %95, %96 : vector<2x4x128xi32>
    %98 = arith.xori %95, %97 : vector<2x4x128xi32>
    %c-1028477387_i32_31 = arith.constant -1028477387 : i32
    %99 = vector.broadcast %c-1028477387_i32_31 : i32 to vector<2x4x128xi32>
    %100 = arith.muli %98, %99 : vector<2x4x128xi32>
    %c16_i32_32 = arith.constant 16 : i32
    %101 = vector.broadcast %c16_i32_32 : i32 to vector<2x4x128xi32>
    %102 = arith.shrui %100, %101 : vector<2x4x128xi32>
    %103 = arith.xori %100, %102 : vector<2x4x128xi32>
    %c1_i32_33 = arith.constant 1 : i32
    %104 = vector.broadcast %c1_i32_33 : i32 to vector<2x4x128xi32>
    %105 = arith.shrui %103, %104 : vector<2x4x128xi32>
    %c1431655765_i32_34 = arith.constant 1431655765 : i32
    %106 = vector.broadcast %c1431655765_i32_34 : i32 to vector<2x4x128xi32>
    %107 = arith.cmpi sge, %105, %106 : vector<2x4x128xi32>
    %cst_35 = arith.constant 0.000000e+00 : f32
    %108 = vector.broadcast %cst_35 : f32 to vector<2x4x128xf32>
    %109 = arith.select %107, %108, %78 : vector<2x4x128xi1>, vector<2x4x128xf32>
    %c0_36 = arith.constant 0 : index
    %c0_37 = arith.constant 0 : index
    %c0_38 = arith.constant 0 : index
    %110 = vector.load %arg7[%c0_36, %c0_37, %c0_38] : memref<2x4x128xf32, #tpu.memory_space<vmem>>, vector<2x4x128xf32>
    tpu.vector_store %arg7[%c0_36, %c0_37, %c0_38], %109 {strides = array<i32>} : memref<2x4x128xf32, #tpu.memory_space<vmem>>, vector<2x4x128xf32>,
    return
  }
  func.func @transform_0(%arg0: i32, %arg1: memref<1xi32, #tpu.memory_space<smem>>) -> (i32, i32, i32) {
    %c0_i32 = arith.constant 0 : i32
    %c0_i32_0 = arith.constant 0 : i32
    %c0_i32_1 = arith.constant 0 : i32
    return %arg0, %c0_i32, %c0_i32_0 : i32, i32, i32
  }
  func.func @transform_1(%arg0: i32, %arg1: memref<1xi32, #tpu.memory_space<smem>>) -> (i32, i32, i32) {
    %c0_i32 = arith.constant 0 : i32
    %c0_i32_0 = arith.constant 0 : i32
    %c0_i32_1 = arith.constant 0 : i32
    return %arg0, %c0_i32, %c0_i32_0 : i32, i32, i32
  }
  func.func @transform_2(%arg0: i32, %arg1: memref<1xi32, #tpu.memory_space<smem>>) -> (i32, i32, i32) {
    %c0_i32 = arith.constant 0 : i32
    %c0_i32_0 = arith.constant 0 : i32
    %c0_i32_1 = arith.constant 0 : i32
    return %arg0, %c0_i32, %c0_i32_0 : i32, i32, i32
  }
  func.func @transform_3(%arg0: i32, %arg1: memref<1xi32, #tpu.memory_space<smem>>) -> (i32, i32, i32) {
    %c0_i32 = arith.constant 0 : i32
    %c0_i32_0 = arith.constant 0 : i32
    %c0_i32_1 = arith.constant 0 : i32
    return %arg0, %c0_i32, %c0_i32_0 : i32, i32, i32
  }
  func.func @transform_4(%arg0: i32, %arg1: memref<1xi32, #tpu.memory_space<smem>>) -> (i32, i32, i32) {
    %c0_i32 = arith.constant 0 : i32
    %c0_i32_0 = arith.constant 0 : i32
    %c0_i32_1 = arith.constant 0 : i32
    return %arg0, %c0_i32, %c0_i32_0 : i32, i32, i32
  }
  func.func @transform_5(%arg0: i32, %arg1: memref<1xi32, #tpu.memory_space<smem>>) -> (i32, i32, i32) {
    %c0_i32 = arith.constant 0 : i32
    %c0_i32_0 = arith.constant 0 : i32
    %c0_i32_1 = arith.constant 0 : i32
    return %arg0, %c0_i32, %c0_i32_0 : i32, i32, i32
  }
}

</mosaic_0001>

<bundles_post_ra>
// kernel: tpu_custom_call.1
= control target key start
LH: loop header
LB: loop body
LE: loop exit
PB: predicated region body
PF: predicated region fallthrough
CT: control target
= control target key end

     0   :  { %13 = vsyncpa [#allocation5], 0  ;;  %s452_s0 = inlined_call_operand.<no memory space> [shape: s32[1], index: 0, kind: input, shape index: {}]   ;;  %s453_s1 = inlined_call_operand.hbm [shape: f32[2,2,128], index: 1, kind: input, shape index: {}]   ;;  %s454_s2 = inlined_call_operand.vmem [shape: f32[2,1,128], index: 2, kind: input, shape index: {}]   ;;  %s455_s3 = inlined_call_operand.vmem [shape: f32[2,4,128], index: 3, kind: input, shape index: {}]   ;;  %s456_s4 = inlined_call_operand.hbm [shape: f32[2,2,128], index: 4, kind: output, shape index: {0}]   ;;  %s457_s5 = inlined_call_operand.hbm [shape: f32[2,1,128], index: 5, kind: output, shape index: {1}]   ;;  %s458_s6 = inlined_call_operand.hbm [shape: f32[2,4,128], index: 6, kind: output, shape index: {2}]  }
   0x1   :  { %14 = vsyncpa [#allocation6], 0 }
   0x2   :  { %15 = vsyncpa [#allocation9], 0  ;;  %s296_s21 = smov [#allocation4]   ;;  %s202_s25 = scalar_lea.hbm %s453_s1, 64 }
   0x3   :  { %s21_s22 = sshll.u32 %s296_s21, 4  ;;  %p203_p0 = scmp.ne.s32.totalorder %s453_s1, %s202_s25  ;;  %s22_s22 = int_to_ptr.vmem [resolvable:$true] %s21_s22 }
   0x4   :  { %p206_p1 = scmp.lt.u32.totalorder %s202_s25, %s453_s1 }
   0x6   :  { %p208_p2 = pnand %p206_p1, %p203_p0 }
   0x8   :  { %211 = shalt.err (!%p208_p2)
}
   0x9   :  { %s212_s30 = scalar_lea.vmem %s22_s22, 64  ;;  %p217_p4 = scmp.lt.s32.totalorder %s22_s22, %s22_s22 }
   0xa   :  { %p213_p3 = scmp.ne.s32.totalorder %s22_s22, %s212_s30  ;;  %p218_p5 = scmp.lt.s32.totalorder %s212_s30, %s212_s30 }
   0xc   :  { %p219_p6 = por %p218_p5, %p217_p4 }
   0xe   :  { %p220_p7 = pnand %p219_p6, %p213_p3 }
  0x10   :  { %223 = shalt.err (!%p220_p7)
}
  0x11   :  { %s297_s7 = smov 32   ;;  %s298_s8 = smov 2  }
  0x12   :  { %27 = dma.hbm_to_vmem [thread:$0]  %s453_s1, 64, %s22_s22, [#allocation5], %s297_s7, %s297_s7, %s298_s8  }
  0x13   :  { %290 = dma.done.wait [#allocation5], 64  }
  0x14   :  { %291 = vsyncadd [#allocation5], 4294967232  ;;  %v46_v0 = vlaneseq  ;;  %v41_v4 = vstv %s452_s0  ;;  %s299_s0 = smov [#allocation8]   ;;  %s300_s13 = smov [#allocation7]  }
  0x15   :  { %v43_v7 = vadd.s32 2654435761, %v41_v4  ;;  %s359_s1 = sshll.u32 %s299_s0, 4  ;;  %s149_s14 = sshll.u32 %s300_s13, 4  ;;  %s371_s14 = int_to_ptr.vmem [resolvable:$true] %s149_s14  ;;  %s379_s1 = int_to_ptr.vmem [resolvable:$true] %s359_s1 }
  0x16   :  { %v47_v1 = vshrl.u32 %v46_v0, 7  ;;  %v50_v2 = vand.u32 127, %v46_v0  ;;  %s301_s15 = smov [#allocation10]   ;;  %s224_s24 = scalar_lea.vmem %s371_s14, 64 }
  0x17   :  { %s173_s16 = sshll.u32 %s301_s15, 4  ;;  %p225_p8 = scmp.ne.s32.totalorder %s371_s14, %s224_s24  ;;  %s381_s16 = int_to_ptr.vmem [resolvable:$true] %s173_s16 }
  0x18   :  { %v48_v3 = vmul.u32 128, %v47_v1  ;;  %v80_v1 = vld [vmem:[%s454_s2] sm:$0x1]  ;;  %p229_p9 = scmp.lt.s32.totalorder %s371_s14, %s371_s14  ;;  %p230_p10 = scmp.lt.s32.totalorder %s224_s24, %s224_s24 }
  0x1a   :  { %v51_v5 = vadd.s32 %v50_v2, %v48_v3  ;;  %v81_v3 = vld [vmem:[%s454_s2 + $0x1] sm:$0x1]  ;;  %p231_p11 = por %p230_p10, %p229_p9 }
  0x1c   :  { %v82_v6 = vshra.s32 %v51_v5, 4  ;;  %v52_v8 = vshra.s32 %v51_v5, 5  ;;  %v116_v9 = vshra.s32 %v51_v5, 6  ;;  %p232_p12 = pnand %p231_p11, %p225_p8 }
  0x1e   :  { %v83_v10 = vmul.u32 2246822519, %v82_v6  ;;  %v53_v11 = vmul.u32 2246822519, %v52_v8  ;;  %v44_v6 = vld [vmem:[#allocation4] sm:$0x3] }
  0x1f   :  { %v117_v12 = vmul.u32 2246822519, %v116_v9  ;;  %v45_v8 = vld [vmem:[#allocation4 + $0x2] sm:$0x3] }
  0x20   :  { %v84_v13 = vadd.s32 %v83_v10, %v41_v4  ;;  %v85_v14 = vadd.s32 %v83_v10, %v43_v7  ;;  %v54_v15 = vadd.s32 %v53_v11, %v41_v4  ;;  %v55_v16 = vadd.s32 %v53_v11, %v43_v7 }
  0x21   :  { %v118_v17 = vadd.s32 %v117_v12, %v41_v4  ;;  %v119_v18 = vadd.s32 %v117_v12, %v43_v7 }
  0x22   :  { %v86_v19 = vshrl.u32 %v84_v13, 16  ;;  %v87_v20 = vshrl.u32 %v85_v14, 16  ;;  %v56_v21 = vshrl.u32 %v54_v15, 16  ;;  %v57_v22 = vshrl.u32 %v55_v16, 16 }
  0x23   :  { %v120_v23 = vshrl.u32 %v118_v17, 16  ;;  %v121_v24 = vshrl.u32 %v119_v18, 16 }
  0x24   :  { %v88_v25 = vxor.u32 %v86_v19, %v84_v13  ;;  %v89_v26 = vxor.u32 %v87_v20, %v85_v14  ;;  %v58_v27 = vxor.u32 %v56_v21, %v54_v15  ;;  %v59_v28 = vxor.u32 %v57_v22, %v55_v16  ;;  %v114_v15 = vld [vmem:[%s455_s3] sm:$0xf] }
  0x25   :  { %v122_v29 = vxor.u32 %v120_v23, %v118_v17  ;;  %v123_v30 = vxor.u32 %v121_v24, %v119_v18  ;;  %v115_v18 = vld [vmem:[%s455_s3 + $0x4] sm:$0xf] }
  0x26   :  { %v90_v31 = vmul.u32 2246822507, %v88_v25  ;;  %v91_v32 = vmul.u32 2246822507, %v89_v26 }
  0x27   :  { %v60_v33 = vmul.u32 2246822507, %v58_v27  ;;  %v61_v34 = vmul.u32 2246822507, %v59_v28 }
  0x28   :  { %v92_v35 = vshrl.u32 %v90_v31, 13  ;;  %v93_v36 = vshrl.u32 %v91_v32, 13  ;;  %v124_v37 = vmul.u32 2246822507, %v122_v29  ;;  %v125_v38 = vmul.u32 2246822507, %v123_v30 }
  0x29   :  { %v62_v39 = vshrl.u32 %v60_v33, 13  ;;  %v63_v40 = vshrl.u32 %v61_v34, 13 }
  0x2a   :  { %v94_v41 = vxor.u32 %v92_v35, %v90_v31  ;;  %v95_v42 = vxor.u32 %v93_v36, %v91_v32  ;;  %v126_v43 = vshrl.u32 %v124_v37, 13  ;;  %v127_v44 = vshrl.u32 %v125_v38, 13 }
  0x2b   :  { %v64_v45 = vxor.u32 %v62_v39, %v60_v33  ;;  %v65_v46 = vxor.u32 %v63_v40, %v61_v34 }
  0x2c   :  { %v96_v47 = vmul.u32 3266489909, %v94_v41  ;;  %v97_v48 = vmul.u32 3266489909, %v95_v42  ;;  %v128_v49 = vxor.u32 %v126_v43, %v124_v37  ;;  %v129_v50 = vxor.u32 %v127_v44, %v125_v38 }
  0x2d   :  { %v66_v51 = vmul.u32 3266489909, %v64_v45  ;;  %v67_v52 = vmul.u32 3266489909, %v65_v46 }
  0x2e   :  { %v98_v53 = vshrl.u32 %v96_v47, 16  ;;  %v99_v54 = vshrl.u32 %v97_v48, 16  ;;  %v130_v55 = vmul.u32 3266489909, %v128_v49  ;;  %v131_v56 = vmul.u32 3266489909, %v129_v50 }
  0x2f   :  { %v68_v57 = vshrl.u32 %v66_v51, 16  ;;  %v69_v58 = vshrl.u32 %v67_v52, 16 }
  0x30   :  { %v100_v59 = vxor.u32 %v98_v53, %v96_v47  ;;  %v101_v60 = vxor.u32 %v99_v54, %v97_v48  ;;  %v132_v61 = vshrl.u32 %v130_v55, 16  ;;  %v133_v62 = vshrl.u32 %v131_v56, 16 }
  0x31   :  { %v70_v63 = vxor.u32 %v68_v57, %v66_v51  ;;  %v71_v0 = vxor.u32 %v69_v58, %v67_v52 }
  0x32   :  { %v102_v2 = vshrl.u32 %v100_v59, 1  ;;  %v103_v4 = vshrl.u32 %v101_v60, 1  ;;  %v134_v5 = vxor.u32 %v132_v61, %v130_v55  ;;  %v135_v10 = vxor.u32 %v133_v62, %v131_v56 }
  0x33   :  { %v72_v7 = vshrl.u32 %v70_v63, 1  ;;  %v73_v9 = vshrl.u32 %v71_v0, 1 }
  0x34   :  { %vm104_vm0 = vcmp.ge.s32.totalorder %v102_v2, 715827883  ;;  %vm106_vm1 = vcmp.lt.s32.totalorder %v102_v2, 1431655765  ;;  %vm367_vm2 = vcmp.ge.s32.totalorder %v103_v4, 715827883 }
  0x35   :  { %vm108_vm3 = vmand %vm104_vm0, %vm106_vm1  ;;  %vm107_vm4 = vcmp.lt.s32.totalorder %v103_v4, 1431655765  ;;  %vm74_vm5 = vcmp.lt.s32.totalorder %v72_v7, 715827883  ;;  %vm75_vm6 = vcmp.lt.s32.totalorder %v73_v9, 715827883 }
  0x36   :  { %v110_v12 = vsel %vm108_vm3, 0.0, %v80_v1  ;;  %vm109_vm7 = vmand %vm367_vm2, %vm107_vm4  ;;  %v76_v13 = vsel %vm74_vm5, 0.0, %v44_v6  ;;  %v77_v14 = vsel %vm75_vm6, 0.0, %v45_v8  ;;  %v136_v16 = vshrl.u32 %v134_v5, 1 }
  0x37   :  { %112 = vst [vmem:[#allocation8] sm:$0x1] %v110_v12  ;;  %v111_v17 = vsel %vm109_vm7, 0.0, %v81_v3  ;;  %78 = vst [vmem:[#allocation7] sm:$0x3] %v76_v13  ;;  %v137_v19 = vshrl.u32 %v135_v10, 1 }
  0x38   :  { %79 = vst [vmem:[#allocation7 + $0x2] sm:$0x3] %v77_v14  ;;  %113 = vst [vmem:[#allocation8 + $0x1] sm:$0x1] %v111_v17  ;;  %vm386_vm8 = vcmp.ge.s32.totalorder %v136_v16, 1431655765 }
  0x39   :  { %235 = shalt.err (!%p232_p12)
}
  0x3a   :  { %s236_s27 = scalar_lea.hbm %s456_s4, 64 }
  0x3b   :  { %p237_p13 = scmp.ne.s32.totalorder %s456_s4, %s236_s27  ;;  %p240_p0 = scmp.lt.u32.totalorder %s236_s27, %s456_s4 }
  0x3d   :  { %p242_p1 = pnand %p240_p0, %p237_p13 }
  0x3f   :  { %245 = shalt.err (!%p242_p1)
}
  0x40   :  { %155 = dma.vmem_to_hbm [thread:$0]  %s371_s14, 64, %s456_s4, [#allocation6], %s297_s7, %s297_s7, %s298_s8   ;;  %v140_v21 = vsel %vm386_vm8, 0.0, %v114_v15  ;;  %vm412_vm9 = vcmp.ge.s32.totalorder %v137_v19, 1431655765 }
  0x41   :  { %s246_s11 = scalar_lea.vmem %s379_s1, 32  ;;  %p251_p3 = scmp.lt.s32.totalorder %s379_s1, %s379_s1 }
  0x42   :  { %p247_p2 = scmp.ne.s32.totalorder %s379_s1, %s246_s11  ;;  %p252_p4 = scmp.lt.s32.totalorder %s246_s11, %s246_s11 }
  0x44   :  { %p253_p5 = por %p252_p4, %p251_p3 }
  0x46   :  { %p254_p6 = pnand %p253_p5, %p247_p2 }
  0x48   :  { %257 = shalt.err (!%p254_p6)
}
  0x49   :  { %s258_s13 = scalar_lea.hbm %s457_s5, 32 }
  0x4a   :  { %p259_p7 = scmp.ne.s32.totalorder %s457_s5, %s258_s13  ;;  %p262_p8 = scmp.lt.u32.totalorder %s258_s13, %s457_s5 }
  0x4c   :  { %p264_p9 = pnand %p262_p8, %p259_p7 }
  0x4e   :  { %267 = shalt.err (!%p264_p9)
}
  0x4f   :  { %s302_s15 = smov 16   ;;  %s303_s17 = smov 1   ;;  %142 = vst [vmem:[#allocation10] sm:$0xf] %v140_v21  ;;  %v141_v23 = vsel %vm412_vm9, 0.0, %v115_v18 }
  0x50   :  { %167 = dma.vmem_to_hbm [thread:$0]  %s379_s1, 32, %s457_s5, [#allocation9], %s302_s15, %s302_s15, %s303_s17   ;;  %143 = vst [vmem:[#allocation10 + $0x4] sm:$0xf] %v141_v23 }
  0x51   :  { %s268_s20 = scalar_lea.vmem %s381_s16, 128  ;;  %p273_p11 = scmp.lt.s32.totalorder %s381_s16, %s381_s16 }
  0x52   :  { %p269_p10 = scmp.ne.s32.totalorder %s381_s16, %s268_s20  ;;  %p274_p12 = scmp.lt.s32.totalorder %s268_s20, %s268_s20 }
  0x54   :  { %p275_p13 = por %p274_p12, %p273_p11 }
  0x56   :  { %p276_p0 = pnand %p275_p13, %p269_p10 }
  0x58   :  { %279 = shalt.err (!%p276_p0)
}
  0x59   :  { %s280_s22 = scalar_lea.hbm %s458_s6, 128 }
  0x5a   :  { %p281_p1 = scmp.ne.s32.totalorder %s458_s6, %s280_s22  ;;  %p284_p2 = scmp.lt.u32.totalorder %s280_s22, %s458_s6 }
  0x5c   :  { %p286_p3 = pnand %p284_p2, %p281_p1 }
  0x5e   :  { %289 = shalt.err (!%p286_p3)
}
  0x5f   :  { %s304_s25 = smov 64   ;;  %s305_s26 = smov 4  }
  0x60   :  { %179 = dma.vmem_to_hbm [thread:$0]  %s381_s16, 128, %s458_s6, [#allocation9], %s304_s25, %s304_s25, %s305_s26  }
  0x61   :  { %292 = dma.done.wait [#allocation6], 64  }
  0x62   :  { %293 = vsyncadd [#allocation6], 4294967232 }
  0x63   :  { %294 = dma.done.wait [#allocation9], 160  }
  0x64   :  { %295 = vsyncadd [#allocation9], 4294967136 }
  0x65   :  { %189 = vsyncpa [#allocation5], 1 }
  0x66   :  { %190 = vsyncpa [#allocation6], 1 }
  0x67   :  { %191 = vsyncpa [#allocation9], 1 }

</bundles_post_ra>
